<compile_context>
chip_gen: v5e
topology: v5e:2x2
jax: 0.10.0
libtpu: 0.0.40
codegen_flags: <defaults>
</compile_context>

<pallas_src>
import jax
import jax.numpy as jnp
from jax.experimental import pallas as pl
from jax.experimental.pallas import tpu as pltpu

LANE = 128  # TPU lane width; narrow feature dims are padded up to this


def expert_kernel(x_ref, w1_ref, b1_ref, w2_ref, b2_ref, o_ref):
    # x:  (TB, D_in)  f32
    # w1: (D_in, Hp)  bf16   (H zero-padded to Hp, multiple of 128)
    # b1: (1, Hp)     f32    (padded entries = 0)
    # w2: (Hp, Dp)    bf16   (D_out zero-padded to Dp, multiple of 128)
    # b2: (1, Dp)     f32    (padded entries = -1e30 -> softmax prob 0)
    # o:  (TB, Dp)    f32    lane-dense store
    x = x_ref[...].astype(jnp.bfloat16)                       # bf16 MXU inputs
    h = jnp.dot(x, w1_ref[...], preferred_element_type=jnp.float32) + b1_ref[...]
    h = jnp.maximum(h, 0.0)                                   # ReLU in f32
    logits = (
        jnp.dot(h.astype(jnp.bfloat16), w2_ref[...],
                preferred_element_type=jnp.float32)
        + b2_ref[...]
    )
    # Softmax over the last axis (== PyTorch dim=1 for 2-D input), all in f32.
    # Padded columns sit at ~-1e30, so exp underflows to exactly 0 and they
    # contribute nothing to the denominator.
    m = jnp.max(logits, axis=-1, keepdims=True)
    e = jnp.exp(logits - m)
    denom = jnp.sum(e, axis=-1, keepdims=True)
    # approx reciprocal: EUP slot (free); rows sum to 1 within ~2^-12.
    o_ref[...] = (e * pl.reciprocal(denom, approx=True)).astype(o_ref.dtype)


def _round_up(n, m):
    return ((n + m - 1) // m) * m


def prepare_expert_params(w1, b1, w2, b2):
    """One-time param prep (outside the hot path): bf16 cast + 128-lane padding.

    w1: (D_in, H), b1: (H,) or (1, H), w2: (H, D_out), b2: (D_out,) or (1, D_out),
    all stored already transposed to (in_features, out_features).
    """
    d_in, h = w1.shape
    d_out = w2.shape[1]
    hp = max(LANE, _round_up(h, LANE))
    dp = max(LANE, _round_up(d_out, LANE))

    # Padded H columns: zero weight + zero bias -> relu(0) = 0 -> no effect.
    w1p = jnp.zeros((d_in, hp), jnp.bfloat16).at[:, :h].set(w1.astype(jnp.bfloat16))
    b1p = jnp.zeros((1, hp), jnp.float32).at[:, :h].set(b1.reshape(1, h))
    # Padded output columns: zero weight + very negative bias -> softmax 0.
    w2p = jnp.zeros((hp, dp), jnp.bfloat16).at[:h, :d_out].set(w2.astype(jnp.bfloat16))
    b2p = jnp.full((1, dp), -1e30, jnp.float32).at[:, :d_out].set(b2.reshape(1, d_out))
    return w1p, b1p, w2p, b2p, d_out


def expert_forward(x, w1p, b1p, w2p, b2p, d_out, *, tb=None):
    """x: (B, D_in) f32, params from prepare_expert_params. Returns (B, D_out) f32."""
    B, d_in = x.shape
    hp = w1p.shape[1]
    dp = w2p.shape[1]

    if tb is None:
        # One block per TensorCore: 2 grid steps (v7x megacore), cheap on v5e/v6e.
        half = (B + 1) // 2
        tb = min(B, max(8, _round_up(half, 8)))
    tb = min(tb, B)
    assert tb % 8 == 0, "batch tile must be a multiple of 8 (f32 sublanes)"

    out_padded = pl.pallas_call(
        expert_kernel,
        out_shape=jax.ShapeDtypeStruct((B, dp), jnp.float32),
        grid=(pl.cdiv(B, tb),),
        in_specs=[
            pl.BlockSpec((tb, d_in), lambda i: (i, 0)),   # x tile, pipelined
            pl.BlockSpec((d_in, hp), lambda i: (0, 0)),   # W1 resident
            pl.BlockSpec((1, hp), lambda i: (0, 0)),      # b1 resident
            pl.BlockSpec((hp, dp), lambda i: (0, 0)),     # W2 resident
            pl.BlockSpec((1, dp), lambda i: (0, 0)),      # b2 resident
        ],
        out_specs=pl.BlockSpec((tb, dp), lambda i: (i, 0)),
        compiler_params=pltpu.CompilerParams(
            dimension_semantics=("parallel",),            # 2 TCs on v7x
            vmem_limit_bytes=32 * 1024 * 1024,            # ample at these dims
        ),
    )(x, w1p, b1p, w2p, b2p)

    # Drop the padded softmax columns (all exactly 0) to match the module.
    return out_padded[:, :d_out]


def init_expert_params(key, input_dim, hidden_dim, output_dim):
    """Deterministic synthetic init (PyTorch-Linear-style uniform bounds)."""
    k1, k2, k3, k4 = jax.random.split(key, 4)
    bound1 = 1.0 / jnp.sqrt(input_dim)
    bound2 = 1.0 / jnp.sqrt(hidden_dim)
    # Stored already transposed: (in_features, out_features)
    w1 = jax.random.uniform(k1, (input_dim, hidden_dim), jnp.float32, -bound1, bound1)
    b1 = jax.random.uniform(k2, (1, hidden_dim), jnp.float32, -bound1, bound1)
    w2 = jax.random.uniform(k3, (hidden_dim, output_dim), jnp.float32, -bound2, bound2)
    b2 = jax.random.uniform(k4, (1, output_dim), jnp.float32, -bound2, bound2)
    return w1, b1, w2, b2


if __name__ == "__main__":
    key = jax.random.PRNGKey(0)
    kx, kp = jax.random.split(key)

    # Small shapes consistent with the module; tb defaults to B/2 = 256.
    batch, input_dim, hidden_dim, output_dim = 512, 32, 64, 16
    x = jax.random.normal(kx, (batch, input_dim), jnp.float32)
    w1, b1, w2, b2 = init_expert_params(kp, input_dim, hidden_dim, output_dim)

    # One-time prep (bf16 cast + lane padding) outside the hot call.
    w1p, b1p, w2p, b2p, d_out = prepare_expert_params(w1, b1, w2, b2)
    w1p, b1p, w2p, b2p = jax.block_until_ready((w1p, b1p, w2p, b2p))

    out = expert_forward(x, w1p, b1p, w2p, b2p, d_out)
    out = jax.block_until_ready(out)

    # Pure-JAX f32 reference. Tolerance accounts for the deliberate
    # bf16-MXU-input accuracy trade (f32 accumulation + f32 softmax inside).
    ref_h = jnp.maximum(x @ w1 + b1, 0.0)
    ref = jax.nn.softmax(ref_h @ w2 + b2, axis=1)
    assert out.shape == (batch, output_dim)
    assert jnp.allclose(out, ref, atol=2e-2, rtol=2e-2)
    # approx reciprocal => row sums within ~2^-12 of 1
    assert jnp.allclose(jnp.sum(out, axis=1), 1.0, atol=1e-3)

    print("KERNEL_OK")
</pallas_src>

<mosaic_0001>
module attributes {stable_mosaic.version = 11 : i64} {
  func.func @expert_kernel(%arg0: i32, %arg1: memref<256x32xf32, #tpu.memory_space<vmem>>, %arg2: memref<32x128xbf16, #tpu.memory_space<vmem>>, %arg3: memref<1x128xf32, #tpu.memory_space<vmem>>, %arg4: memref<128x128xbf16, #tpu.memory_space<vmem>>, %arg5: memref<1x128xf32, #tpu.memory_space<vmem>>, %arg6: memref<256x128xf32, #tpu.memory_space<vmem>>) attributes {dimension_semantics = [#tpu.dimension_semantics<parallel>], iteration_bounds = array<i64: 2>, scalar_prefetch = 0 : i64, scratch_operands = 0 : i64, tpu.core_type = #tpu.core_type<tc>, window_params = [{transform_indices = @transform_0, window_bounds = array<i64: 256, 32>}, {pipeline_mode = #tpu.pipeline_mode<synchronous>, transform_indices = @transform_1, window_bounds = array<i64: 32, 128>}, {pipeline_mode = #tpu.pipeline_mode<synchronous>, transform_indices = @transform_2, window_bounds = array<i64: 1, 128>}, {pipeline_mode = #tpu.pipeline_mode<synchronous>, transform_indices = @transform_3, window_bounds = array<i64: 128, 128>}, {pipeline_mode = #tpu.pipeline_mode<synchronous>, transform_indices = @transform_4, window_bounds = array<i64: 1, 128>}, {transform_indices = @transform_5, window_bounds = array<i64: 256, 128>}]} {
    %c0 = arith.constant 0 : index
    %c0_0 = arith.constant 0 : index
    %0 = vector.load %arg1[%c0, %c0_0] : memref<256x32xf32, #tpu.memory_space<vmem>>, vector<256x32xf32>
    %1 = arith.truncf %0 : vector<256x32xf32> to vector<256x32xbf16>
    %c0_1 = arith.constant 0 : index
    %c0_2 = arith.constant 0 : index
    %2 = vector.load %arg2[%c0_1, %c0_2] : memref<32x128xbf16, #tpu.memory_space<vmem>>, vector<32x128xbf16>
    %cst = arith.constant dense<0.000000e+00> : vector<256x128xf32>
    %3 = tpu.matmul %1, %2, %cst {dimension_numbers = #tpu.dot_dimension_numbers<[1], [0], [0], [1], [0, 0, 1, 1], [], []>} : vector<256x32xbf16>, vector<32x128xbf16>, vector<256x128xf32> -> vector<256x128xf32>
    %c0_3 = arith.constant 0 : index
    %c0_4 = arith.constant 0 : index
    %4 = vector.load %arg3[%c0_3, %c0_4] : memref<1x128xf32, #tpu.memory_space<vmem>>, vector<1x128xf32>
    %5 = vector.broadcast %4 : vector<1x128xf32> to vector<256x128xf32>
    %6 = arith.addf %3, %5 : vector<256x128xf32>
    %cst_5 = arith.constant 0.000000e+00 : f32
    %7 = vector.broadcast %cst_5 : f32 to vector<256x128xf32>
    %8 = arith.maximumf %6, %7 : vector<256x128xf32>
    %9 = arith.truncf %8 : vector<256x128xf32> to vector<256x128xbf16>
    %c0_6 = arith.constant 0 : index
    %c0_7 = arith.constant 0 : index
    %10 = vector.load %arg4[%c0_6, %c0_7] : memref<128x128xbf16, #tpu.memory_space<vmem>>, vector<128x128xbf16>
    %cst_8 = arith.constant dense<0.000000e+00> : vector<256x128xf32>
    %11 = tpu.matmul %9, %10, %cst_8 {dimension_numbers = #tpu.dot_dimension_numbers<[1], [0], [0], [1], [0, 0, 1, 1], [], []>} : vector<256x128xbf16>, vector<128x128xbf16>, vector<256x128xf32> -> vector<256x128xf32>
    %c0_9 = arith.constant 0 : index
    %c0_10 = arith.constant 0 : index
    %12 = vector.load %arg5[%c0_9, %c0_10] : memref<1x128xf32, #tpu.memory_space<vmem>>, vector<1x128xf32>
    %13 = vector.broadcast %12 : vector<1x128xf32> to vector<256x128xf32>
    %14 = arith.addf %11, %13 : vector<256x128xf32>
    %cst_11 = arith.constant dense<0xFF800000> : vector<256xf32>
    %15 = vector.multi_reduction <maximumf>, %14, %cst_11 [1] : vector<256x128xf32> to vector<256xf32>
    %16 = vector.shape_cast %15 : vector<256xf32> to vector<256x1xf32>
    %17 = vector.broadcast %16 : vector<256x1xf32> to vector<256x128xf32>
    %18 = arith.subf %14, %17 : vector<256x128xf32>
    %19 = math.exp %18 : vector<256x128xf32>
    %cst_12 = arith.constant dense<0.000000e+00> : vector<256xf32>
    %20 = vector.multi_reduction <add>, %19, %cst_12 [1] : vector<256x128xf32> to vector<256xf32>
    %21 = vector.shape_cast %20 : vector<256xf32> to vector<256x1xf32>
    %22 = tpu.reciprocal %21 {approx = true} : vector<256x1xf32> -> vector<256x1xf32>
    %23 = vector.broadcast %22 : vector<256x1xf32> to vector<256x128xf32>
    %24 = arith.mulf %19, %23 : vector<256x128xf32>
    %c0_13 = arith.constant 0 : index
    %c0_14 = arith.constant 0 : index
    %25 = vector.load %arg6[%c0_13, %c0_14] : memref<256x128xf32, #tpu.memory_space<vmem>>, vector<256x128xf32>
    tpu.vector_store %arg6[%c0_13, %c0_14], %24 {strides = array<i32>} : memref<256x128xf32, #tpu.memory_space<vmem>>, vector<256x128xf32>,
    return
  }
  func.func @transform_0(%arg0: i32) -> (i32, i32) {
    %c0_i32 = arith.constant 0 : i32
    %c0_i32_0 = arith.constant 0 : i32
    return %arg0, %c0_i32 : i32, i32
  }
  func.func @transform_1(%arg0: i32) -> (i32, i32) {
    %c0_i32 = arith.constant 0 : i32
    %c0_i32_0 = arith.constant 0 : i32
    %c0_i32_1 = arith.constant 0 : i32
    return %c0_i32, %c0_i32_0 : i32, i32
  }
  func.func @transform_2(%arg0: i32) -> (i32, i32) {
    %c0_i32 = arith.constant 0 : i32
    %c0_i32_0 = arith.constant 0 : i32
    %c0_i32_1 = arith.constant 0 : i32
    return %c0_i32, %c0_i32_0 : i32, i32
  }
  func.func @transform_3(%arg0: i32) -> (i32, i32) {
    %c0_i32 = arith.constant 0 : i32
    %c0_i32_0 = arith.constant 0 : i32
    %c0_i32_1 = arith.constant 0 : i32
    return %c0_i32, %c0_i32_0 : i32, i32
  }
  func.func @transform_4(%arg0: i32) -> (i32, i32) {
    %c0_i32 = arith.constant 0 : i32
    %c0_i32_0 = arith.constant 0 : i32
    %c0_i32_1 = arith.constant 0 : i32
    return %c0_i32, %c0_i32_0 : i32, i32
  }
  func.func @transform_5(%arg0: i32) -> (i32, i32) {
    %c0_i32 = arith.constant 0 : i32
    %c0_i32_0 = arith.constant 0 : i32
    return %arg0, %c0_i32 : i32, i32
  }
}

</mosaic_0001>

<bundles_post_ra>
// kernel: tpu_custom_call.1
= control target key start
LH: loop header
LB: loop body
LE: loop exit
PB: predicated region body
PF: predicated region fallthrough
CT: control target
= control target key end

     0   :  { %10 = vsyncpa [#allocation3], 0  ;;  %s1925_s0 = inlined_call_operand.vmem [shape: f32[512,32], index: 0, kind: input, shape index: {}]   ;;  %s1926_s1 = inlined_call_operand.vmem [shape: bf16[32,128], index: 1, kind: input, shape index: {}]   ;;  %s1927_s2 = inlined_call_operand.vmem [shape: f32[1,128], index: 2, kind: input, shape index: {}]   ;;  %s1928_s3 = inlined_call_operand.vmem [shape: bf16[128,128], index: 3, kind: input, shape index: {}]   ;;  %s1929_s4 = inlined_call_operand.vmem [shape: f32[1,128], index: 4, kind: input, shape index: {}]   ;;  %s1930_s5 = inlined_call_operand.hbm [shape: f32[512,128], index: 5, kind: output, shape index: {}]  }
   0x1   :  { %12 = vsyncpa [#allocation3 + $0x1], 0  ;;  %s1392_s18 = smov 0   ;;  %s1394_s19 = smov 0  }
   0x2   :  { %s1396_s20 = smov 0   ;;  %s1398_s21 = smov 0  }
   0x3 LB: > { %s1413_s22 = sadd.s32 4294967295, %s1358_s21   ;;  %s1036_s23 = sadd.s32 4294967294, %s1358_s21   ;;  %s1358_s21 = sphi %s1398_s21, %s1936_s21   ;;  %s1354_s20 = sphi %s1396_s20, %s1935_s20   ;;  %s1350_s19 = sphi %s1394_s19, %s1934_s19   ;;  %s1346_s18 = sphi %s1392_s18, %s1933_s18  }
   0x4   : > { %s1417_s24 = sadd.s32 1, %s1358_s21   ;;  %s135_s25 = sadd.s32 1, %s1354_s20 }
   0x5   : > { %s132_s26 = ssub.s32 %s1358_s21, %s1417_s24  ;;  %p145_p0 = scmp.ne.s32.totalorder %s1354_s20, %s1350_s19 }
   0x6   : > { %p133_p1 = scmp.eq.s32.totalorder %s132_s26, 0  ;;  %p146_p2 = scmp.eq.s32.totalorder %s1413_s22, 1 }
   0x7   : > { %p151_p3 = scmp.ne.s32.totalorder %s1350_s19, %s1346_s18  ;;  %p152_p4 = scmp.eq.s32.totalorder %s1036_s23, 1 }
   0x8   : > { %s1428_s27 = scalar_select %p133_p1, %s1354_s20, %s135_s25  }
   0x9   : > { %p1430_p5 = por %p146_p2, %p145_p0  ;;  %p1434_p6 = por %p152_p4, %p151_p3 }
   0xa   : > { %p1039_p7 = scmp.ge.s32.totalorder %s1358_s21, 1  ;;  %p191_p8 = scmp.lt.s32.totalorder %s1358_s21, 3 }
   0xc   : > { %p192_p9 = pnand %p1039_p7, %p191_p8 }
   0xd   : > { %s1041_s7 = sshll.u32 (!%p192_p9), %s1413_s22, 5  ;;  %s216_s23 = sand.u32 (!%p192_p9), 1, %s1350_s19  }
   0xe   : > { %195 = sbr.rel (%p192_p9) target bundleno = 805 (0x325), region = 40  ;;  %p220_p10 = scmp.lt.s32.totalorder (!%p192_p9), %s1041_s7, 63 }
   0xf   : > { %s1040_s25 = sshll.u32 (!%p192_p9), %s216_s23, 8  ;;  %s1114_s30 = sshll.u32 (!%p192_p9), %s1413_s22, 8 }
  0x10   : > { %s1746_s26 = scalar_lea.vmem (!%p192_p9), [#allocation2], %s1040_s25  ;;  %s970_s8 = scalar_lea.hbm (!%p192_p9), %s1930_s5, %s1114_s30 }
  0x11   : > { %s971_s9 = sshll.u32 (!%p192_p9), %s1746_s26, 4  ;;  %s959_s22 = scalar_lea.sflag (!%p192_p9), [#allocation3], %s216_s23  ;;  %s972_s9 = int_to_ptr.vmem [resolvable:$true] %s971_s9 }
  0x12   : > { %s1316_s16 = scalar_lea.hbm (!%p192_p9), %s1930_s5, 512 }
  0x13   : > { %v1105_v0 = vld [vmem:[%s1926_s1 + $0x8] sm:$0xff]  ;;  %v1104_v1 = vld [vmem:[%s1926_s1] sm:$0xff]  ;;  %s1938_s7 = smov (!%p220_p10, %s1041_s7), 63  ;;  %vm295_vm0 = vcmask 261120   ;;  %v1113_v17 = vld [vmem:[%s1928_s3 + $0x38] sm:$0xff] }
  0x14   : > { %350 = vmatpush.bf16.msra.mxu0 %v1105_v0  ;;  %1115 = vmatpush.bf16.msra.mxu3 %v1105_v0  ;;  %s1042_s10 = sshll.u32 %s1938_s7, 3  ;;  %v1112_v21 = vld [vmem:[%s1928_s3 + $0x30] sm:$0xff]  ;;  %v1111_v22 = vld [vmem:[%s1928_s3 + $0x28] sm:$0xff]  ;;  %v1110_v23 = vld [vmem:[%s1928_s3 + $0x20] sm:$0xff] }
  0x15   : > { %s1450_s13 = scalar_lea.vmem %s1925_s0, %s1042_s10  ;;  %549 = vmatpush.bf16.msra.mxu1 %v1113_v17  ;;  %1117 = vmatpush.bf16.msra.mxu2 %v1113_v17  ;;  %v1109_v26 = vld [vmem:[%s1928_s3 + $0x18] sm:$0xff]  ;;  %v1108_v28 = vld [vmem:[%s1928_s3 + $0x10] sm:$0xff]  ;;  %v1107_v32 = vld [vmem:[%s1928_s3 + $0x8] sm:$0xff]  ;;  %s973_s10 = sshll.u32 %s970_s8, 4  ;;  %s974_s10 = int_to_ptr.hbm [resolvable:$true] %s973_s10 }
  0x16   : > { %v227_v2 = vld [vmem:[%s1450_s13] sm:$0xff]  ;;  %v228_v3 = vld [vmem:[%s1450_s13 + $0x8] sm:$0xff]  ;;  %v229_v5 = vld [vmem:[%s1450_s13 + $0x10] sm:$0xff]  ;;  %s1310_s11 = sshra.s32 %s974_s10, 4  ;;  %s1311_s11 = int_to_ptr.hbm [resolvable:$true] %s1310_s11 }
  0x17   : > { %v259_v4 = vpack.c.bf16 %v228_v3, %v227_v2  ;;  %v230_v6 = vld [vmem:[%s1450_s13 + $0x18] sm:$0xff]  ;;  %v231_v8 = vld [vmem:[%s1450_s13 + $0x20] sm:$0xff]  ;;  %v232_v9 = vld [vmem:[%s1450_s13 + $0x28] sm:$0xff]  ;;  %s1312_s12 = scalar_lea.hbm %s1311_s11, 256  ;;  %p1317_p0 = scmp.lt.s32.totalorder %s1311_s11, %s1930_s5 }
  0x18   : > { %351 = vmatpush.bf16.msra.mxu0 %v1104_v1  ;;  %1116 = vmatpush.bf16.msra.mxu3 %v1104_v1  ;;  %v260_v7 = vpack.c.bf16 %v230_v6, %v229_v5  ;;  %v261_v10 = vpack.c.bf16 %v232_v9, %v231_v8  ;;  %v233_v11 = vld [vmem:[%s1450_s13 + $0x30] sm:$0xff]  ;;  %v234_v12 = vld [vmem:[%s1450_s13 + $0x38] sm:$0xff]  ;;  %v235_v14 = vld [vmem:[%s1450_s13 + $0x40] sm:$0xff]  ;;  %p1313_p11 = scmp.ne.s32.totalorder %s1311_s11, %s1312_s12  ;;  %p1318_p1 = scmp.lt.s32.totalorder %s1316_s16, %s1312_s12 }
  0x19   : > { %v262_v13 = vpack.c.bf16 %v234_v12, %v233_v11  ;;  %v236_v15 = vld [vmem:[%s1450_s13 + $0x48] sm:$0xff]  ;;  %v237_v18 = vld [vmem:[%s1450_s13 + $0x50] sm:$0xff]  ;;  %v238_v19 = vld [vmem:[%s1450_s13 + $0x58] sm:$0xff]  ;;  %550 = vmatpush.bf16.msra.mxu1 %v1112_v21  ;;  %1118 = vmatpush.bf16.msra.mxu2 %v1112_v21 }
  0x1a   : > { %v263_v16 = vpack.c.bf16 %v236_v15, %v235_v14  ;;  %v264_v20 = vpack.c.bf16 %v238_v19, %v237_v18  ;;  %v239_v24 = vld [vmem:[%s1450_s13 + $0x60] sm:$0xff]  ;;  %v240_v25 = vld [vmem:[%s1450_s13 + $0x68] sm:$0xff]  ;;  %v245_v29 = vld [vmem:[%s1450_s13 + $0x90] sm:$0xff]  ;;  %p1314_p12 = pnand %p1313_p11, %p1430_p5  ;;  %p1319_p2 = por %p1318_p1, %p1317_p0 }
  0x1b   : > { %1051 = vmatmul.msk.bf16.vlgmr.msra.gmra.mxu0 %vm295_vm0, %v259_v4  ;;  %v265_v27 = vpack.c.bf16 %v240_v25, %v239_v24  ;;  %v246_v30 = vld [vmem:[%s1450_s13 + $0x98] sm:$0xff]  ;;  %v1106_v33 = vld [vmem:[%s1928_s3] sm:$0xff]  ;;  %v241_v34 = vld [vmem:[%s1450_s13 + $0x70] sm:$0xff] }
  0x1c   : > { %v268_v31 = vpack.c.bf16 %v246_v30, %v245_v29  ;;  %v242_v35 = vld [vmem:[%s1450_s13 + $0x78] sm:$0xff]  ;;  %v247_v37 = vld [vmem:[%s1450_s13 + $0xa0] sm:$0xff]  ;;  %v248_v38 = vld [vmem:[%s1450_s13 + $0xa8] sm:$0xff]  ;;  %p1315_p13 = pneg %p1314_p12 }
  0x1d   : > { %551 = vmatpush.bf16.msra.mxu1 %v1111_v22  ;;  %1119 = vmatpush.bf16.msra.mxu2 %v1111_v22  ;;  %v266_v36 = vpack.c.bf16 %v242_v35, %v241_v34  ;;  %v269_v39 = vpack.c.bf16 %v248_v38, %v247_v37  ;;  %v243_v40 = vld [vmem:[%s1450_s13 + $0x80] sm:$0xff]  ;;  %v244_v41 = vld [vmem:[%s1450_s13 + $0x88] sm:$0xff]  ;;  %v249_v44 = vld [vmem:[%s1450_s13 + $0xb0] sm:$0xff] }
  0x1e   : > { %1060 = vmatmul.msk.bf16.vlgmr.msra.gmra.mxu3 %vm295_vm0, %v268_v31  ;;  %v267_v42 = vpack.c.bf16 %v244_v41, %v243_v40  ;;  %v250_v45 = vld [vmem:[%s1450_s13 + $0xb8] sm:$0xff]  ;;  %v1513_v46 = vld [vmem:[%s1927_s2] ss:$0 sm:$0xff]  ;;  %v252_v56 = vld [vmem:[%s1450_s13 + $0xc8] sm:$0xff]  ;;  %p1320_p3 = pnand %p1319_p2, %p1315_p13 }
  0x1f   : > { %v270_v47 = vpack.c.bf16 %v250_v45, %v249_v44  ;;  %v251_v55 = vld [vmem:[%s1450_s13 + $0xc0] sm:$0xff]  ;;  %v253_v1 = vld [vmem:[%s1450_s13 + $0xd0] sm:$0xff]  ;;  %v254_v2 = vld [vmem:[%s1450_s13 + $0xd8] sm:$0xff] }
  0x20   : > { %v271_v57 = vpack.c.bf16 %v252_v56, %v251_v55  ;;  %v272_v3 = vpack.c.bf16 %v254_v2, %v253_v1  ;;  %v255_v11 = vld [vmem:[%s1450_s13 + $0xe0] sm:$0xff]  ;;  %v256_v12 = vld [vmem:[%s1450_s13 + $0xe8] sm:$0xff]  ;;  %v257_v21 = vld [vmem:[%s1450_s13 + $0xf0] sm:$0xff] }
  0x21   : > { %552 = vmatpush.bf16.msra.mxu1 %v1110_v23  ;;  %1120 = vmatpush.bf16.msra.mxu2 %v1110_v23  ;;  %v258_v22 = vld [vmem:[%s1450_s13 + $0xf8] sm:$0xff] }
  0x22   : > { %v274_v23 = vpack.c.bf16 %v258_v22, %v257_v21 }
  0x25   : > { %553 = vmatpush.bf16.msra.mxu1 %v1109_v26  ;;  %1121 = vmatpush.bf16.msra.mxu2 %v1109_v26 }
  0x29   : > { %554 = vmatpush.bf16.msra.mxu1 %v1108_v28  ;;  %1122 = vmatpush.bf16.msra.mxu2 %v1108_v28 }
  0x2b   : > { %1052 = vmatmul.msk.bf16.gmra.mxu0 %vm295_vm0, %v260_v7 }
  0x2d   : > { %555 = vmatpush.bf16.msra.mxu1 %v1107_v32  ;;  %1123 = vmatpush.bf16.msra.mxu2 %v1107_v32 }
  0x2e   : > { %1061 = vmatmul.msk.bf16.gmra.mxu3 %vm295_vm0, %v269_v39 }
  0x31   : > { %556 = vmatpush.bf16.msra.mxu1 %v1106_v33  ;;  %1124 = vmatpush.bf16.msra.mxu2 %v1106_v33 }
  0x3b   : > { %1053 = vmatmul.msk.bf16.gmra.mxu0 %vm295_vm0, %v261_v10 }
  0x3e   : > { %1062 = vmatmul.msk.bf16.gmra.mxu3 %vm295_vm0, %v270_v47 }
  0x4b   : > { %1054 = vmatmul.msk.bf16.gmra.mxu0 %vm295_vm0, %v262_v13  ;;  %v273_v13 = vpack.c.bf16 %v256_v12, %v255_v11 }
  0x4e   : > { %1063 = vmatmul.msk.bf16.gmra.mxu3 %vm295_vm0, %v271_v57 }
  0x5b   : > { %1055 = vmatmul.msk.bf16.gmra.mxu0 %vm295_vm0, %v263_v16 }
  0x5e   : > { %1064 = vmatmul.msk.bf16.gmra.mxu3 %vm295_vm0, %v272_v3 }
  0x6b   : > { %1056 = vmatmul.msk.bf16.gmra.mxu0 %vm295_vm0, %v264_v20 }
  0x6e   : > { %1065 = vmatmul.msk.bf16.gmra.mxu3 %vm295_vm0, %v273_v13 }
  0x7b   : > { %1057 = vmatmul.msk.bf16.gmra.mxu0 %vm295_vm0, %v265_v27 }
  0x7e   : > { %1066 = vmatmul.msk.bf16.gmra.mxu3 %vm295_vm0, %v274_v23 }
  0x8b   : > { %1058 = vmatmul.msk.bf16.gmra.mxu0 %vm295_vm0, %v266_v36 }
  0x98   : > { %v353_v43 = vpop.f32.mrf.mxu0 }
  0x99   : > { %v354_v48 = vadd.f32 %v1513_v46, %v353_v43 }
  0x9b   : > { %1059 = vmatmul.msk.bf16.gmra.mxu0 %vm295_vm0, %v267_v42  ;;  %v433_v51 = vmax.f32 %v354_v48, 0.0 }
  0xa0   : > { %v355_v49 = vpop.f32.mrf.mxu0 }
  0xa1   : > { %v356_v50 = vadd.f32 %v1513_v46, %v355_v49  ;;  %v398_v45 = vpop.f32.mrf.mxu3 }
  0xa2   : > { %v399_v3 = vadd.f32 %v1513_v46, %v398_v45 }
  0xa3   : > { %v434_v52 = vmax.f32 %v356_v50, 0.0 }
  0xa5   : > { %v465_v53 = vpack.c.bf16 %v434_v52, %v433_v51 }
  0xa7   : > { %557 = vmatmul.bf16.vlgmr.msra.gmra.mxu1 %v465_v53 }
  0xa8   : > { %v358_v54 = vpop.f32.mrf.mxu0 }
  0xa9   : > { %v359_v58 = vadd.f32 %v1513_v46, %v358_v54  ;;  %v400_v50 = vpop.f32.mrf.mxu3 }
  0xab   : > { %v435_v61 = vmax.f32 %v359_v58, 0.0 }
  0xb0   : > { %v360_v59 = vpop.f32.mrf.mxu0 }
  0xb1   : > { %v361_v60 = vadd.f32 %v1513_v46, %v360_v59  ;;  %v403_v55 = vpop.f32.mrf.mxu3  ;;  %v1550_v59 = vld [vmem:[%s1929_s4] ss:$0 sm:$0xff] }
  0xb3   : > { %v436_v62 = vmax.f32 %v361_v60, 0.0 }
  0xb5   : > { %v466_v63 = vpack.c.bf16 %v436_v62, %v435_v61 }
  0xb7   : > { %562 = vmatmul.bf16.gmra.mxu1 %v466_v63 }
  0xb8   : > { %v363_v0 = vpop.f32.mrf.mxu0 }
  0xb9   : > { %v364_v4 = vadd.f32 %v1513_v46, %v363_v0  ;;  %v405_v1 = vpop.f32.mrf.mxu3 }
  0xbb   : > { %v437_v7 = vmax.f32 %v364_v4, 0.0  ;;  %v401_v4 = vadd.f32 %v1513_v46, %v400_v50 }
  0xc0   : > { %v365_v5 = vpop.f32.mrf.mxu0 }
  0xc1   : > { %v366_v6 = vadd.f32 %v1513_v46, %v365_v5 }
  0xc3   : > { %v438_v8 = vmax.f32 %v366_v6, 0.0  ;;  %v408_v6 = vpop.f32.mrf.mxu3 }
  0xc5   : > { %v467_v9 = vpack.c.bf16 %v438_v8, %v437_v7  ;;  %v451_v7 = vmax.f32 %v399_v3, 0.0  ;;  %v452_v8 = vmax.f32 %v401_v4, 0.0 }
  0xc7   : > { %567 = vmatmul.bf16.gmra.mxu1 %v467_v9  ;;  %v474_v11 = vpack.c.bf16 %v452_v8, %v451_v7 }
  0xc8   : > { %v368_v10 = vpop.f32.mrf.mxu0 }
  0xc9   : > { %v369_v14 = vadd.f32 %v1513_v46, %v368_v10 }
  0xcb   : > { %v439_v17 = vmax.f32 %v369_v14, 0.0  ;;  %v410_v12 = vpop.f32.mrf.mxu3  ;;  %v404_v14 = vadd.f32 %v1513_v46, %v403_v55 }
  0xd0   : > { %v370_v15 = vpop.f32.mrf.mxu0 }
  0xd1   : > { %v371_v16 = vadd.f32 %v1513_v46, %v370_v15  ;;  %v406_v15 = vadd.f32 %v1513_v46, %v405_v1 }
  0xd3   : > { %v440_v18 = vmax.f32 %v371_v16, 0.0 }
  0xd5   : > { %v468_v19 = vpack.c.bf16 %v440_v18, %v439_v17  ;;  %v453_v17 = vmax.f32 %v404_v14, 0.0  ;;  %v454_v18 = vmax.f32 %v406_v15, 0.0 }
  0xd7   : > { %572 = vmatmul.bf16.gmra.mxu1 %v468_v19  ;;  %v475_v22 = vpack.c.bf16 %v454_v18, %v453_v17 }
  0xd8   : > { %v373_v20 = vpop.f32.mrf.mxu0 }
  0xd9   : > { %v374_v24 = vadd.f32 %v1513_v46, %v373_v20  ;;  %v413_v20 = vpop.f32.mrf.mxu3 }
  0xdb   : > { %v441_v27 = vmax.f32 %v374_v24, 0.0  ;;  %v409_v24 = vadd.f32 %v1513_v46, %v408_v6 }
  0xe0   : > { %v375_v25 = vpop.f32.mrf.mxu0 }
  0xe1   : > { %v376_v26 = vadd.f32 %v1513_v46, %v375_v25  ;;  %v411_v25 = vadd.f32 %v1513_v46, %v410_v12 }
  0xe3   : > { %v442_v28 = vmax.f32 %v376_v26, 0.0 }
  0xe5   : > { %v469_v29 = vpack.c.bf16 %v442_v28, %v441_v27  ;;  %v415_v27 = vpop.f32.mrf.mxu3  ;;  %v455_v28 = vmax.f32 %v409_v24, 0.0 }
  0xe7   : > { %577 = vmatmul.bf16.gmra.mxu1 %v469_v29  ;;  %v456_v29 = vmax.f32 %v411_v25, 0.0 }
  0xe8   : > { %v378_v30 = vpop.f32.mrf.mxu0 }
  0xe9   : > { %v379_v31 = vadd.f32 %v1513_v46, %v378_v30 }
  0xeb   : > { %v443_v34 = vmax.f32 %v379_v31, 0.0 }
  0xf0   : > { %v380_v32 = vpop.f32.mrf.mxu0 }
  0xf1   : > { %v381_v33 = vadd.f32 %v1513_v46, %v380_v32  ;;  %v476_v32 = vpack.c.bf16 %v456_v29, %v455_v28 }
  0xf3   : > { %v444_v35 = vmax.f32 %v381_v33, 0.0  ;;  %v418_v33 = vpop.f32.mrf.mxu3 }
  0xf5   : > { %v470_v36 = vpack.c.bf16 %v444_v35, %v443_v34  ;;  %v414_v35 = vadd.f32 %v1513_v46, %v413_v20 }
  0xf7   : > { %582 = vmatmul.bf16.gmra.mxu1 %v470_v36  ;;  %v416_v36 = vadd.f32 %v1513_v46, %v415_v27 }
  0xf8   : > { %v383_v37 = vpop.f32.mrf.mxu0 }
  0xf9   : > { %v384_v38 = vadd.f32 %v1513_v46, %v383_v37 }
  0xfb   : > { %v445_v41 = vmax.f32 %v384_v38, 0.0  ;;  %v457_v38 = vmax.f32 %v414_v35, 0.0 }
 0x100   : > { %v385_v39 = vpop.f32.mrf.mxu0 }
 0x101   : > { %v386_v40 = vadd.f32 %v1513_v46, %v385_v39  ;;  %v458_v39 = vmax.f32 %v416_v36, 0.0 }
 0x103   : > { %v446_v42 = vmax.f32 %v386_v40, 0.0  ;;  %v420_v40 = vpop.f32.mrf.mxu3 }
 0x105   : > { %v471_v43 = vpack.c.bf16 %v446_v42, %v445_v41 }
 0x107   : > { %587 = vmatmul.bf16.gmra.mxu1 %v471_v43  ;;  %v477_v43 = vpack.c.bf16 %v458_v39, %v457_v38 }
 0x108   : > { %v388_v44 = vpop.f32.mrf.mxu0 }
 0x109   : > { %v389_v47 = vadd.f32 %v1513_v46, %v388_v44 }
 0x10b   : > { %v447_v51 = vmax.f32 %v389_v47, 0.0  ;;  %v423_v45 = vpop.f32.mrf.mxu3  ;;  %v419_v47 = vadd.f32 %v1513_v46, %v418_v33 }
 0x10d   : > { %v459_v50 = vmax.f32 %v419_v47, 0.0 }
 0x110   : > { %v390_v48 = vpop.f32.mrf.mxu0 }
 0x111   : > { %v391_v49 = vadd.f32 %v1513_v46, %v390_v48  ;;  %v421_v48 = vadd.f32 %v1513_v46, %v420_v40 }
 0x113   : > { %v448_v52 = vmax.f32 %v391_v49, 0.0  ;;  %v425_v55 = vpop.f32.mrf.mxu3 }
 0x115   : > { %v472_v53 = vpack.c.bf16 %v448_v52, %v447_v51  ;;  %v460_v51 = vmax.f32 %v421_v48, 0.0 }
 0x117   : > { %592 = vmatmul.bf16.gmra.mxu1 %v472_v53 }
 0x118   : > { %v393_v54 = vpop.f32.mrf.mxu0 }
 0x119   : > { %v394_v56 = vadd.f32 %v1513_v46, %v393_v54  ;;  %v478_v54 = vpack.c.bf16 %v460_v51, %v459_v50 }
 0x11b   : > { %v449_v60 = vmax.f32 %v394_v56, 0.0 }
 0x120   : > { %v395_v57 = vpop.f32.mrf.mxu0 }
 0x121   : > { %v396_v58 = vadd.f32 %v1513_v46, %v395_v57  ;;  %v424_v57 = vadd.f32 %v1513_v46, %v423_v45 }
 0x123   : > { %v450_v61 = vmax.f32 %v396_v58, 0.0  ;;  %v426_v58 = vadd.f32 %v1513_v46, %v425_v55 }
 0x124   : > { %v558_v62 = vpop.f32.mrf.mxu1 }
 0x125   : > { %v1553_v63 = vadd.f32 %v1550_v59, %v558_v62  ;;  %v473_v0 = vpack.c.bf16 %v450_v61, %v449_v60  ;;  %v428_v61 = vpop.f32.mrf.mxu3  ;;  %v461_v62 = vmax.f32 %v424_v57, 0.0 }
 0x126   : > { %v429_v7 = vadd.f32 %v1513_v46, %v428_v61 }
 0x127   : > { %597 = vmatmul.bf16.vlgmr.msra.gmra.mxu2 %v473_v0  ;;  %638 = vmax.xlane.f32.xlu0 %v1553_v63  ;;  %v462_v0 = vmax.f32 %v426_v58, 0.0 }
 0x129   : > { %v479_v3 = vpack.c.bf16 %v462_v0, %v461_v62 }
 0x12c   : > { %v560_v2 = vpop.f32.mrf.mxu1 }
 0x12d   : > { %v1559_v5 = vadd.f32 %v1550_v59, %v560_v2  ;;  %v430_v4 = vpop.f32.mrf.mxu3 }
 0x12e   : > { %v431_v8 = vadd.f32 %v1513_v46, %v430_v4 }
 0x12f   : > { %640 = vmax.xlane.f32.xlu0 %v1559_v5 }
 0x130   : > { %v464_v12 = vmax.f32 %v431_v8, 0.0 }
 0x134   : > { %v563_v9 = vpop.f32.mrf.mxu1 }
 0x135   : > { %v1563_v10 = vadd.f32 %v1550_v59, %v563_v9 }
 0x137   : > { %602 = vmatmul.bf16.gmra.mxu2 %v474_v11  ;;  %642 = vmax.xlane.f32.xlu1 %v1563_v10  ;;  %v463_v11 = vmax.f32 %v429_v7, 0.0 }
 0x139   : > { %v480_v15 = vpack.c.bf16 %v464_v12, %v463_v11 }
 0x13c   : > { %v565_v13 = vpop.f32.mrf.mxu1 }
 0x13d   : > { %v1569_v16 = vadd.f32 %v1550_v59, %v565_v13 }
 0x13f   : > { %644 = vmax.xlane.f32.xlu1 %v1569_v16 }
 0x144   : > { %v568_v19 = vpop.f32.mrf.mxu1 }
 0x145   : > { %v1573_v21 = vadd.f32 %v1550_v59, %v568_v19 }
 0x147   : > { %607 = vmatmul.bf16.gmra.mxu2 %v475_v22  ;;  %646 = vmax.xlane.f32.xlu2 %v1573_v21 }
 0x14c   : > { %v570_v23 = vpop.f32.mrf.mxu1 }
 0x14d   : > { %v1579_v26 = vadd.f32 %v1550_v59, %v570_v23 }
 0x14f   : > { %648 = vmax.xlane.f32.xlu2 %v1579_v26 }
 0x154   : > { %v573_v30 = vpop.f32.mrf.mxu1 }
 0x155   : > { %v1583_v31 = vadd.f32 %v1550_v59, %v573_v30 }
 0x157   : > { %612 = vmatmul.bf16.gmra.mxu2 %v476_v32  ;;  %650 = vmax.xlane.f32.xlu0 %v1583_v31 }
 0x15c   : > { %v575_v34 = vpop.f32.mrf.mxu1 }
 0x15d   : > { %v1589_v37 = vadd.f32 %v1550_v59, %v575_v34 }
 0x15f   : > { %652 = vmax.xlane.f32.xlu1 %v1589_v37 }
 0x164   : > { %v578_v41 = vpop.f32.mrf.mxu1 }
 0x165   : > { %v1593_v42 = vadd.f32 %v1550_v59, %v578_v41 }
 0x167   : > { %617 = vmatmul.bf16.gmra.mxu2 %v477_v43  ;;  %654 = vmax.xlane.f32.xlu2 %v1593_v42 }
 0x16c   : > { %v580_v44 = vpop.f32.mrf.mxu1 }
 0x16d   : > { %v1599_v49 = vadd.f32 %v1550_v59, %v580_v44 }
 0x16f   : > { %656 = vmax.xlane.f32.xlu0 %v1599_v49 }
 0x174   : > { %v583_v52 = vpop.f32.mrf.mxu1 }
 0x175   : > { %v1603_v53 = vadd.f32 %v1550_v59, %v583_v52 }
 0x177   : > { %622 = vmatmul.bf16.gmra.mxu2 %v478_v54  ;;  %658 = vmax.xlane.f32.xlu1 %v1603_v53 }
 0x17c   : > { %v585_v56 = vpop.f32.mrf.mxu1 }
 0x17d   : > { %v1609_v60 = vadd.f32 %v1550_v59, %v585_v56 }
 0x17f   : > { %660 = vmax.xlane.f32.xlu2 %v1609_v60 }
 0x184   : > { %v588_v1 = vpop.f32.mrf.mxu1 }
 0x185   : > { %v1613_v2 = vadd.f32 %v1550_v59, %v588_v1 }
 0x187   : > { %627 = vmatmul.bf16.gmra.mxu2 %v479_v3  ;;  %662 = vmax.xlane.f32.xlu0 %v1613_v2 }
 0x18c   : > { %v590_v6 = vpop.f32.mrf.mxu1 }
 0x18d   : > { %v1619_v9 = vadd.f32 %v1550_v59, %v590_v6 }
 0x18f   : > { %664 = vmax.xlane.f32.xlu1 %v1619_v9 }
 0x194   : > { %v593_v13 = vpop.f32.mrf.mxu1 }
 0x195   : > { %v1623_v14 = vadd.f32 %v1550_v59, %v593_v13 }
 0x197   : > { %632 = vmatmul.bf16.gmra.mxu2 %v480_v15  ;;  %666 = vmax.xlane.f32.xlu2 %v1623_v14 }
 0x19a   : > { %v639_v17 = vpop.xlane.xlu0 %638 }
 0x19b   : > { %v702_v18 = vsub.f32 %v1553_v63, %v639_v17 }
 0x19c   : > { %v595_v19 = vpop.f32.mrf.mxu1 }
 0x19d   : > { %v734_v46 = vmul.f32 1.442695, %v702_v18  ;;  %v1628_v20 = vadd.f32 %v1550_v59, %v595_v19 }
 0x19f   : > { %1168 = vpow2.f32 %v734_v46  ;;  %668 = vmax.xlane.f32.xlu0 %v1628_v20 }
 0x1a2   : > { %v641_v22 = vpop.xlane.xlu0 %640 }
 0x1a3   : > { %v703_v23 = vsub.f32 %v1559_v5, %v641_v22 }
 0x1a5   : > { %v1632_v24 = vpop.eup %1168  ;;  %v736_v25 = vmul.f32 1.442695, %v703_v23 }
 0x1a6   : > { %798 = vadd.xlane.f32.xlu2 %v1632_v24 }
 0x1a7   : > { %1170 = vpow2.f32 %v736_v25 }
 0x1aa   : > { %v598_v27 = vpop.f32.mrf.mxu2  ;;  %v643_v28 = vpop.xlane.xlu1 %642 }
 0x1ab   : > { %v1636_v63 = vadd.f32 %v1550_v59, %v598_v27  ;;  %v704_v29 = vsub.f32 %v1563_v10, %v643_v28 }
 0x1ad   : > { %v1639_v30 = vpop.eup %1170  ;;  %v738_v32 = vmul.f32 1.442695, %v704_v29  ;;  %670 = vmax.xlane.f32.xlu1 %v1636_v63 }
 0x1ae   : > { %800 = vadd.xlane.f32.xlu0 %v1639_v30 }
 0x1af   : > { %1172 = vpow2.f32 %v738_v32 }
 0x1b2   : > { %v600_v5 = vpop.f32.mrf.mxu2  ;;  %v645_v33 = vpop.xlane.xlu1 %644 }
 0x1b3   : > { %v1644_v34 = vadd.f32 %v1550_v59, %v600_v5  ;;  %v705_v35 = vsub.f32 %v1569_v16, %v645_v33 }
 0x1b5   : > { %v1647_v36 = vpop.eup %1172  ;;  %v740_v38 = vmul.f32 1.442695, %v705_v35  ;;  %672 = vmax.xlane.f32.xlu2 %v1644_v34 }
 0x1b6   : > { %802 = vadd.xlane.f32.xlu1 %v1647_v36 }
 0x1b7   : > { %1174 = vpow2.f32 %v740_v38 }
 0x1ba   : > { %v603_v10 = vpop.f32.mrf.mxu2  ;;  %v647_v39 = vpop.xlane.xlu2 %646 }
 0x1bb   : > { %v1652_v40 = vadd.f32 %v1550_v59, %v603_v10  ;;  %v706_v41 = vsub.f32 %v1573_v21, %v647_v39 }
 0x1bd   : > { %v1655_v43 = vpop.eup %1174  ;;  %v742_v44 = vmul.f32 1.442695, %v706_v41  ;;  %674 = vmax.xlane.f32.xlu0 %v1652_v40 }
 0x1be   : > { %804 = vadd.xlane.f32.xlu2 %v1655_v43 }
 0x1bf   : > { %1176 = vpow2.f32 %v742_v44 }
 0x1c2   : > { %v605_v16 = vpop.f32.mrf.mxu2  ;;  %v649_v45 = vpop.xlane.xlu2 %648 }
 0x1c3   : > { %v1660_v47 = vadd.f32 %v1550_v59, %v605_v16  ;;  %v707_v48 = vsub.f32 %v1579_v26, %v649_v45 }
 0x1c5   : > { %v1663_v50 = vpop.eup %1176  ;;  %v744_v51 = vmul.f32 1.442695, %v707_v48  ;;  %676 = vmax.xlane.f32.xlu1 %v1660_v47 }
 0x1c6   : > { %806 = vadd.xlane.f32.xlu0 %v1663_v50 }
 0x1c7   : > { %1178 = vpow2.f32 %v744_v51 }
 0x1ca   : > { %v608_v21 = vpop.f32.mrf.mxu2  ;;  %v651_v52 = vpop.xlane.xlu0 %650 }
 0x1cb   : > { %v1668_v54 = vadd.f32 %v1550_v59, %v608_v21  ;;  %v708_v55 = vsub.f32 %v1583_v31, %v651_v52 }
 0x1cd   : > { %v1671_v56 = vpop.eup %1178  ;;  %v746_v57 = vmul.f32 1.442695, %v708_v55  ;;  %678 = vmax.xlane.f32.xlu2 %v1668_v54 }
 0x1ce   : > { %808 = vadd.xlane.f32.xlu1 %v1671_v56 }
 0x1cf   : > { %1180 = vpow2.f32 %v746_v57 }
 0x1d2   : > { %v610_v26 = vpop.f32.mrf.mxu2  ;;  %v653_v58 = vpop.xlane.xlu1 %652 }
 0x1d3   : > { %v1676_v61 = vadd.f32 %v1550_v59, %v610_v26  ;;  %v709_v62 = vsub.f32 %v1589_v37, %v653_v58 }
 0x1d5   : > { %v1679_v0 = vpop.eup %1180  ;;  %v748_v1 = vmul.f32 1.442695, %v709_v62  ;;  %680 = vmax.xlane.f32.xlu0 %v1676_v61 }
 0x1d6   : > { %810 = vadd.xlane.f32.xlu2 %v1679_v0 }
 0x1d7   : > { %1182 = vpow2.f32 %v748_v1 }
 0x1da   : > { %v613_v31 = vpop.f32.mrf.mxu2  ;;  %v655_v3 = vpop.xlane.xlu2 %654 }
 0x1db   : > { %v1684_v4 = vadd.f32 %v1550_v59, %v613_v31  ;;  %v710_v6 = vsub.f32 %v1593_v42, %v655_v3 }
 0x1dd   : > { %v1687_v7 = vpop.eup %1182  ;;  %v750_v8 = vmul.f32 1.442695, %v710_v6  ;;  %682 = vmax.xlane.f32.xlu1 %v1684_v4 }
 0x1de   : > { %812 = vadd.xlane.f32.xlu0 %v1687_v7 }
 0x1df   : > { %1184 = vpow2.f32 %v750_v8 }
 0x1e2   : > { %v615_v37 = vpop.f32.mrf.mxu2  ;;  %v657_v11 = vpop.xlane.xlu0 %656 }
 0x1e3   : > { %v1692_v12 = vadd.f32 %v1550_v59, %v615_v37  ;;  %v711_v13 = vsub.f32 %v1599_v49, %v657_v11 }
 0x1e5   : > { %v1695_v15 = vpop.eup %1184  ;;  %v752_v17 = vmul.f32 1.442695, %v711_v13  ;;  %684 = vmax.xlane.f32.xlu2 %v1692_v12 }
 0x1e6   : > { %814 = vadd.xlane.f32.xlu1 %v1695_v15 }
 0x1e7   : > { %1186 = vpow2.f32 %v752_v17 }
 0x1ea   : > { %v618_v42 = vpop.f32.mrf.mxu2  ;;  %v659_v18 = vpop.xlane.xlu1 %658 }
 0x1eb   : > { %v1700_v19 = vadd.f32 %v1550_v59, %v618_v42  ;;  %v712_v46 = vsub.f32 %v1603_v53, %v659_v18 }
 0x1ed   : > { %v1703_v22 = vpop.eup %1186  ;;  %v754_v23 = vmul.f32 1.442695, %v712_v46  ;;  %686 = vmax.xlane.f32.xlu0 %v1700_v19 }
 0x1ee   : > { %816 = vadd.xlane.f32.xlu2 %v1703_v22 }
 0x1ef   : > { %1188 = vpow2.f32 %v754_v23 }
 0x1f2   : > { %v620_v49 = vpop.f32.mrf.mxu2  ;;  %v661_v5 = vpop.xlane.xlu2 %660 }
 0x1f3   : > { %v1708_v25 = vadd.f32 %v1550_v59, %v620_v49 }
 0x1f5   : > { %v1710_v27 = vpop.eup %1188  ;;  %688 = vmax.xlane.f32.xlu1 %v1708_v25 }
 0x1f6   : > { %818 = vadd.xlane.f32.xlu0 %v1710_v27 }
 0x1fa   : > { %v623_v28 = vpop.f32.mrf.mxu2  ;;  %v663_v35 = vpop.xlane.xlu0 %662 }
 0x1fb   : > { %v1715_v53 = vadd.f32 %v1550_v59, %v623_v28  ;;  %v714_v10 = vsub.f32 %v1613_v2, %v663_v35 }
 0x1fd   : > { %690 = vmax.xlane.f32.xlu2 %v1715_v53  ;;  %v758_v41 = vmul.f32 1.442695, %v714_v10 }
 0x1ff   : > { %1190 = vpow2.f32 %v758_v41 }
 0x202   : > { %v625_v29 = vpop.f32.mrf.mxu2  ;;  %v665_v16 = vpop.xlane.xlu1 %664 }
 0x203   : > { %v1719_v32 = vadd.f32 %v1550_v59, %v625_v29  ;;  %v715_v51 = vsub.f32 %v1619_v9, %v665_v16  ;;  %v713_v9 = vsub.f32 %v1609_v60, %v661_v5 }
 0x205   : > { %692 = vmax.xlane.f32.xlu0 %v1719_v32  ;;  %v760_v55 = vmul.f32 1.442695, %v715_v51  ;;  %v1737_v58 = vpop.eup %1190  ;;  %v756_v6 = vmul.f32 1.442695, %v713_v9 }
 0x20a   : > { %v628_v33 = vpop.f32.mrf.mxu2  ;;  %v667_v39 = vpop.xlane.xlu2 %666 }
 0x20b   : > { %v1723_v38 = vadd.f32 %v1550_v59, %v628_v33 }
 0x20d   : > { %694 = vmax.xlane.f32.xlu1 %v1723_v38 }
 0x212   : > { %v630_v44 = vpop.f32.mrf.mxu2  ;;  %v669_v48 = vpop.xlane.xlu0 %668 }
 0x213   : > { %v1728_v45 = vadd.f32 %v1550_v59, %v630_v44  ;;  %v717_v21 = vsub.f32 %v1628_v20, %v669_v48 }
 0x215   : > { %696 = vmax.xlane.f32.xlu2 %v1728_v45  ;;  %v764_v57 = vmul.f32 1.442695, %v717_v21 }
 0x219   : > { %v799_v52 = vpop.xlane.xlu2 %798 }
 0x21a   : > { %1192 = vrcp.f32 %v799_v52  ;;  %v633_v2 = vpop.f32.mrf.mxu2 }
 0x21b   : > { %v1735_v26 = vadd.f32 %v1550_v59, %v633_v2  ;;  %1194 = vpow2.f32 %v760_v55 }
 0x21c   : > { %1196 = vpow2.f32 %v764_v57 }
 0x21d   : > { %698 = vmax.xlane.f32.xlu0 %v1735_v26  ;;  %822 = vadd.xlane.f32.xlu2 %v1737_v58 }
 0x220   : > { %v1193_v20 = vpop.eup %1192  ;;  %v671_v62 = vpop.xlane.xlu1 %670 }
 0x221   : > { %v894_v1 = vmul.f32 %v1193_v20, %v1632_v24  ;;  %v718_v31 = vsub.f32 %v1636_v63, %v671_v62  ;;  %v801_v3 = vpop.xlane.xlu0 %800  ;;  %v1752_v60 = vpop.eup %1194  ;;  %v716_v24 = vsub.f32 %v1623_v14, %v667_v39 }
 0x222   : > { %1198 = vrcp.f32 %v801_v3  ;;  %v635_v8 = vpop.f32.mrf.mxu2  ;;  %v1754_v13 = vpop.eup %1196 }
 0x223   : > { %926 = vst [vmem:[%s1746_s26] sm:$0xff] %v894_v1  ;;  %v766_v37 = vmul.f32 1.442695, %v718_v31  ;;  %v1750_v11 = vadd.f32 %v1550_v59, %v635_v8  ;;  %v762_v18 = vmul.f32 1.442695, %v716_v24 }
 0x225   : > { %1200 = vpow2.f32 %v766_v37  ;;  %700 = vmax.xlane.f32.xlu1 %v1750_v11  ;;  %824 = vadd.xlane.f32.xlu0 %v1752_v60 }
 0x226   : > { %1202 = vpow2.f32 %v756_v6  ;;  %828 = vadd.xlane.f32.xlu2 %v1754_v13 }
 0x228   : > { %v1199_v63 = vpop.eup %1198  ;;  %v673_v17 = vpop.xlane.xlu2 %672 }
 0x229   : > { %v895_v59 = vmul.f32 %v1199_v63, %v1639_v30  ;;  %v803_v42 = vpop.xlane.xlu1 %802  ;;  %v719_v14 = vsub.f32 %v1644_v34, %v673_v17 }
 0x22a   : > { %1204 = vrcp.f32 %v803_v42 }
 0x22b   : > { %v1761_v46 = vpop.eup %1200  ;;  %927 = vst [vmem:[%s1746_s26 + $0x8] sm:$0xff] %v895_v59  ;;  %1206 = vpow2.f32 %v762_v18  ;;  %v768_v33 = vmul.f32 1.442695, %v719_v14 }
 0x22c   : > { %v1764_v23 = vpop.eup %1202 }
 0x22d   : > { %820 = vadd.xlane.f32.xlu1 %v1764_v23  ;;  %830 = vadd.xlane.f32.xlu0 %v1761_v46 }
 0x230   : > { %v1205_v49 = vpop.eup %1204  ;;  %v675_v28 = vpop.xlane.xlu0 %674 }
 0x231   : > { %v896_v30 = vmul.f32 %v1205_v49, %v1647_v36  ;;  %v720_v29 = vsub.f32 %v1652_v40, %v675_v28  ;;  %v805_v5 = vpop.xlane.xlu2 %804  ;;  %v1772_v10 = vpop.eup %1206 }
 0x232   : > { %1208 = vrcp.f32 %v805_v5 }
 0x233   : > { %928 = vst [vmem:[%s1746_s26 + $0x10] sm:$0xff] %v896_v30  ;;  %v770_v35 = vmul.f32 1.442695, %v720_v29 }
 0x235   : > { %1210 = vpow2.f32 %v770_v35  ;;  %826 = vadd.xlane.f32.xlu1 %v1772_v10 }
 0x236   : > { %1212 = vpow2.f32 %v768_v33 }
 0x238   : > { %v1209_v39 = vpop.eup %1208  ;;  %v677_v34 = vpop.xlane.xlu1 %676 }
 0x239   : > { %v897_v41 = vmul.f32 %v1209_v39, %v1655_v43  ;;  %v721_v36 = vsub.f32 %v1660_v47, %v677_v34  ;;  %v807_v44 = vpop.xlane.xlu0 %806 }
 0x23a   : > { %1214 = vrcp.f32 %v807_v44 }
 0x23b   : > { %v1777_v40 = vpop.eup %1210  ;;  %929 = vst [vmem:[%s1746_s26 + $0x18] sm:$0xff] %v897_v41  ;;  %v772_v16 = vmul.f32 1.442695, %v721_v36 }
 0x23c   : > { %v1780_v48 = vpop.eup %1212  ;;  %834 = vadd.xlane.f32.xlu2 %v1777_v40 }
 0x23d   : > { %1216 = vpow2.f32 %v772_v16  ;;  %832 = vadd.xlane.f32.xlu1 %v1780_v48 }
 0x240   : > { %v1215_v51 = vpop.eup %1214  ;;  %v679_v21 = vpop.xlane.xlu2 %678 }
 0x241   : > { %v898_v43 = vmul.f32 %v1215_v51, %v1663_v50  ;;  %v722_v47 = vsub.f32 %v1668_v54, %v679_v21  ;;  %v809_v52 = vpop.xlane.xlu1 %808 }
 0x242   : > { %1218 = vrcp.f32 %v809_v52 }
 0x243   : > { %v1786_v55 = vpop.eup %1216  ;;  %930 = vst [vmem:[%s1746_s26 + $0x20] sm:$0xff] %v898_v43  ;;  %v774_v2 = vmul.f32 1.442695, %v722_v47 }
 0x244   : > { %836 = vadd.xlane.f32.xlu0 %v1786_v55 }
 0x245   : > { %1220 = vpow2.f32 %v774_v2 }
 0x248   : > { %v1219_v57 = vpop.eup %1218  ;;  %v681_v9 = vpop.xlane.xlu0 %680 }
 0x249   : > { %v899_v20 = vmul.f32 %v1219_v57, %v1671_v56  ;;  %v723_v62 = vsub.f32 %v1676_v61, %v681_v9  ;;  %v811_v50 = vpop.xlane.xlu2 %810 }
 0x24a   : > { %1222 = vrcp.f32 %v811_v50 }
 0x24b   : > { %v1792_v1 = vpop.eup %1220  ;;  %931 = vst [vmem:[%s1746_s26 + $0x28] sm:$0xff] %v899_v20  ;;  %v776_v54 = vmul.f32 1.442695, %v723_v62 }
 0x24c   : > { %838 = vadd.xlane.f32.xlu1 %v1792_v1 }
 0x24d   : > { %1224 = vpow2.f32 %v776_v54 }
 0x250   : > { %v1223_v31 = vpop.eup %1222  ;;  %v683_v3 = vpop.xlane.xlu1 %682 }
 0x251   : > { %v900_v6 = vmul.f32 %v1223_v31, %v1679_v0  ;;  %v724_v8 = vsub.f32 %v1684_v4, %v683_v3  ;;  %v813_v56 = vpop.xlane.xlu0 %812 }
 0x252   : > { %1226 = vrcp.f32 %v813_v56 }
 0x253   : > { %v1798_v37 = vpop.eup %1224  ;;  %932 = vst [vmem:[%s1746_s26 + $0x30] sm:$0xff] %v900_v6  ;;  %v778_v61 = vmul.f32 1.442695, %v724_v8 }
 0x254   : > { %840 = vadd.xlane.f32.xlu2 %v1798_v37 }
 0x255   : > { %1228 = vpow2.f32 %v778_v61 }
 0x258   : > { %v1227_v24 = vpop.eup %1226  ;;  %v685_v63 = vpop.xlane.xlu2 %684 }
 0x259   : > { %v901_v17 = vmul.f32 %v1227_v24, %v1687_v7  ;;  %v725_v59 = vsub.f32 %v1692_v12, %v685_v63  ;;  %v815_v0 = vpop.xlane.xlu1 %814 }
 0x25a   : > { %1230 = vrcp.f32 %v815_v0 }
 0x25b   : > { %v1804_v42 = vpop.eup %1228  ;;  %933 = vst [vmem:[%s1746_s26 + $0x38] sm:$0xff] %v901_v17  ;;  %v780_v4 = vmul.f32 1.442695, %v725_v59 }
 0x25c   : > { %842 = vadd.xlane.f32.xlu0 %v1804_v42 }
 0x25d   : > { %1232 = vpow2.f32 %v780_v4 }
 0x260   : > { %v1231_v18 = vpop.eup %1230  ;;  %v687_v14 = vpop.xlane.xlu0 %686 }
 0x261   : > { %v902_v49 = vmul.f32 %v1231_v18, %v1695_v15  ;;  %v726_v28 = vsub.f32 %v1700_v19, %v687_v14  ;;  %v817_v7 = vpop.xlane.xlu2 %816 }
 0x262   : > { %1234 = vrcp.f32 %v817_v7 }
 0x263   : > { %v1810_v30 = vpop.eup %1232  ;;  %934 = vst [vmem:[%s1746_s26 + $0x40] sm:$0xff] %v902_v49  ;;  %v782_v12 = vmul.f32 1.442695, %v726_v28 }
 0x264   : > { %844 = vadd.xlane.f32.xlu1 %v1810_v30 }
 0x265   : > { %1236 = vpow2.f32 %v782_v12 }
 0x268   : > { %v1235_v29 = vpop.eup %1234  ;;  %v689_v5 = vpop.xlane.xlu1 %688 }
 0x269   : > { %v903_v33 = vmul.f32 %v1235_v29, %v1703_v22  ;;  %v727_v35 = vsub.f32 %v1708_v25, %v689_v5  ;;  %v819_v15 = vpop.xlane.xlu0 %818 }
 0x26a   : > { %1238 = vrcp.f32 %v819_v15 }
 0x26b   : > { %v1816_v39 = vpop.eup %1236  ;;  %935 = vst [vmem:[%s1746_s26 + $0x48] sm:$0xff] %v903_v33  ;;  %v784_v19 = vmul.f32 1.442695, %v727_v35 }
 0x26c   : > { %846 = vadd.xlane.f32.xlu2 %v1816_v39 }
 0x26d   : > { %1240 = vpow2.f32 %v784_v19 }
 0x270   : > { %v1239_v34 = vpop.eup %1238  ;;  %v691_v41 = vpop.xlane.xlu2 %690 }
 0x271   : > { %v904_v36 = vmul.f32 %v1239_v34, %v1710_v27  ;;  %v728_v44 = vsub.f32 %v1715_v53, %v691_v41 }
 0x273   : > { %v1822_v16 = vpop.eup %1240  ;;  %936 = vst [vmem:[%s1746_s26 + $0x50] sm:$0xff] %v904_v36  ;;  %v786_v22 = vmul.f32 1.442695, %v728_v44 }
 0x274   : > { %848 = vadd.xlane.f32.xlu0 %v1822_v16 }
 0x275   : > { %1242 = vpow2.f32 %v786_v22 }
 0x278   : > { %v693_v25 = vpop.xlane.xlu0 %692 }
 0x279   : > { %v729_v51 = vsub.f32 %v1719_v32, %v693_v25 }
 0x27b   : > { %v1827_v21 = vpop.eup %1242  ;;  %v788_v43 = vmul.f32 1.442695, %v729_v51 }
 0x27c   : > { %850 = vadd.xlane.f32.xlu1 %v1827_v21 }
 0x27d   : > { %1244 = vpow2.f32 %v788_v43 }
 0x280   : > { %v695_v47 = vpop.xlane.xlu1 %694 }
 0x281   : > { %v730_v27 = vsub.f32 %v1723_v38, %v695_v47 }
 0x283   : > { %v1831_v53 = vpop.eup %1244  ;;  %v790_v52 = vmul.f32 1.442695, %v730_v27 }
 0x284   : > { %852 = vadd.xlane.f32.xlu2 %v1831_v53 }
 0x285   : > { %1246 = vpow2.f32 %v790_v52 }
 0x288   : > { %v697_v2 = vpop.xlane.xlu2 %696 }
 0x289   : > { %v731_v57 = vsub.f32 %v1728_v45, %v697_v2 }
 0x28b   : > { %v1835_v9 = vpop.eup %1246  ;;  %v792_v32 = vmul.f32 1.442695, %v731_v57 }
 0x28c   : > { %854 = vadd.xlane.f32.xlu0 %v1835_v9 }
 0x28d   : > { %1248 = vpow2.f32 %v792_v32 }
 0x290   : > { %v823_v20 = vpop.xlane.xlu2 %822  ;;  %v699_v62 = vpop.xlane.xlu0 %698 }
 0x291   : > { %1250 = vrcp.f32 %v823_v20  ;;  %v732_v38 = vsub.f32 %v1735_v26, %v699_v62 }
 0x293   : > { %v1839_v50 = vpop.eup %1248  ;;  %v794_v54 = vmul.f32 1.442695, %v732_v38 }
 0x294   : > { %856 = vadd.xlane.f32.xlu1 %v1839_v50 }
 0x295   : > { %1252 = vpow2.f32 %v794_v54 }
 0x297   : > { %v1251_v31 = vpop.eup %1250 }
 0x298   : > { %v906_v45 = vmul.f32 %v1251_v31, %v1737_v58  ;;  %v701_v3 = vpop.xlane.xlu1 %700  ;;  %v825_v6 = vpop.xlane.xlu0 %824 }
 0x299   : > { %v733_v8 = vsub.f32 %v1750_v11, %v701_v3  ;;  %v829_v56 = vpop.xlane.xlu2 %828  ;;  %1254 = vrcp.f32 %v825_v6 }
 0x29a   : > { %938 = vst [vmem:[%s1746_s26 + $0x60] sm:$0xff] %v906_v45  ;;  %1256 = vrcp.f32 %v829_v56 }
 0x29b   : > { %v1845_v26 = vpop.eup %1252  ;;  %v796_v61 = vmul.f32 1.442695, %v733_v8 }
 0x29c   : > { %858 = vadd.xlane.f32.xlu2 %v1845_v26 }
 0x29d   : > { %1258 = vpow2.f32 %v796_v61 }
 0x29f   : > { %v1255_v24 = vpop.eup %1254 }
 0x2a0   : > { %v1257_v63 = vpop.eup %1256  ;;  %v907_v58 = vmul.f32 %v1255_v24, %v1752_v60  ;;  %v821_v17 = vpop.xlane.xlu1 %820 }
 0x2a1   : > { %v831_v11 = vpop.xlane.xlu0 %830  ;;  %v909_v59 = vmul.f32 %v1257_v63, %v1754_v13  ;;  %1260 = vrcp.f32 %v821_v17 }
 0x2a2   : > { %939 = vst [vmem:[%s1746_s26 + $0x68] sm:$0xff] %v907_v58  ;;  %1262 = vrcp.f32 %v831_v11 }
 0x2a3   : > { %v1851_v0 = vpop.eup %1258  ;;  %941 = vst [vmem:[%s1746_s26 + $0x78] sm:$0xff] %v909_v59 }
 0x2a4   : > { %860 = vadd.xlane.f32.xlu0 %v1851_v0 }
 0x2a7   : > { %v1261_v4 = vpop.eup %1260 }
 0x2a8   : > { %v1263_v18 = vpop.eup %1262  ;;  %v905_v14 = vmul.f32 %v1261_v4, %v1764_v23  ;;  %v827_v60 = vpop.xlane.xlu1 %826 }
 0x2a9   : > { %v910_v49 = vmul.f32 %v1263_v18, %v1761_v46  ;;  %1264 = vrcp.f32 %v827_v60 }
 0x2aa   : > { %937 = vst [vmem:[%s1746_s26 + $0x58] sm:$0xff] %v905_v14 }
 0x2ab   : > { %942 = vst [vmem:[%s1746_s26 + $0x80] sm:$0xff] %v910_v49 }
 0x2af   : > { %v1265_v13 = vpop.eup %1264  ;;  %v835_v28 = vpop.xlane.xlu2 %834 }
 0x2b0   : > { %v908_v7 = vmul.f32 %v1265_v13, %v1772_v10  ;;  %1266 = vrcp.f32 %v835_v28  ;;  %v833_v12 = vpop.xlane.xlu1 %832 }
 0x2b1   : > { %1268 = vrcp.f32 %v833_v12 }
 0x2b2   : > { %940 = vst [vmem:[%s1746_s26 + $0x70] sm:$0xff] %v908_v7 }
 0x2b6   : > { %v1267_v29 = vpop.eup %1266 }
 0x2b7   : > { %v1269_v5 = vpop.eup %1268  ;;  %v912_v23 = vmul.f32 %v1267_v29, %v1777_v40  ;;  %v837_v46 = vpop.xlane.xlu0 %836 }
 0x2b8   : > { %v911_v33 = vmul.f32 %v1269_v5, %v1780_v48  ;;  %1270 = vrcp.f32 %v837_v46 }
 0x2b9   : > { %944 = vst [vmem:[%s1746_s26 + $0x90] sm:$0xff] %v912_v23 }
 0x2ba   : > { %943 = vst [vmem:[%s1746_s26 + $0x88] sm:$0xff] %v911_v33 }
 0x2be   : > { %v1271_v35 = vpop.eup %1270 }
 0x2bf   : > { %v913_v10 = vmul.f32 %v1271_v35, %v1786_v55  ;;  %v839_v15 = vpop.xlane.xlu1 %838 }
 0x2c0   : > { %1272 = vrcp.f32 %v839_v15 }
 0x2c1   : > { %945 = vst [vmem:[%s1746_s26 + $0x98] sm:$0xff] %v913_v10 }
 0x2c6   : > { %v1273_v19 = vpop.eup %1272 }
 0x2c7   : > { %v914_v34 = vmul.f32 %v1273_v19, %v1792_v1  ;;  %v841_v41 = vpop.xlane.xlu2 %840 }
 0x2c8   : > { %1274 = vrcp.f32 %v841_v41 }
 0x2c9   : > { %946 = vst [vmem:[%s1746_s26 + $0xa0] sm:$0xff] %v914_v34 }
 0x2ce   : > { %v1275_v40 = vpop.eup %1274 }
 0x2cf   : > { %v915_v48 = vmul.f32 %v1275_v40, %v1798_v37  ;;  %v843_v36 = vpop.xlane.xlu0 %842 }
 0x2d0   : > { %1276 = vrcp.f32 %v843_v36 }
 0x2d1   : > { %947 = vst [vmem:[%s1746_s26 + $0xa8] sm:$0xff] %v915_v48 }
 0x2d6   : > { %v1277_v44 = vpop.eup %1276 }
 0x2d7   : > { %v916_v55 = vmul.f32 %v1277_v44, %v1804_v42  ;;  %v845_v22 = vpop.xlane.xlu1 %844 }
 0x2d8   : > { %1278 = vrcp.f32 %v845_v22 }
 0x2d9   : > { %948 = vst [vmem:[%s1746_s26 + $0xb0] sm:$0xff] %v916_v55 }
 0x2de   : > { %v1279_v25 = vpop.eup %1278 }
 0x2df   : > { %v917_v1 = vmul.f32 %v1279_v25, %v1810_v30  ;;  %v847_v51 = vpop.xlane.xlu2 %846 }
 0x2e0   : > { %1280 = vrcp.f32 %v847_v51 }
 0x2e1   : > { %949 = vst [vmem:[%s1746_s26 + $0xb8] sm:$0xff] %v917_v1 }
 0x2e6   : > { %v1281_v43 = vpop.eup %1280 }
 0x2e7   : > { %v918_v37 = vmul.f32 %v1281_v43, %v1816_v39  ;;  %v849_v47 = vpop.xlane.xlu0 %848 }
 0x2e8   : > { %1282 = vrcp.f32 %v849_v47 }
 0x2e9   : > { %950 = vst [vmem:[%s1746_s26 + $0xc0] sm:$0xff] %v918_v37 }
 0x2ee   : > { %v1283_v27 = vpop.eup %1282 }
 0x2ef   : > { %v919_v42 = vmul.f32 %v1283_v27, %v1822_v16  ;;  %v851_v52 = vpop.xlane.xlu1 %850 }
 0x2f0   : > { %1284 = vrcp.f32 %v851_v52 }
 0x2f1   : > { %951 = vst [vmem:[%s1746_s26 + $0xc8] sm:$0xff] %v919_v42 }
 0x2f6   : > { %v1285_v2 = vpop.eup %1284 }
 0x2f7   : > { %v920_v30 = vmul.f32 %v1285_v2, %v1827_v21  ;;  %v853_v57 = vpop.xlane.xlu2 %852 }
 0x2f8   : > { %1286 = vrcp.f32 %v853_v57 }
 0x2f9   : > { %952 = vst [vmem:[%s1746_s26 + $0xd0] sm:$0xff] %v920_v30 }
 0x2fe   : > { %v1287_v39 = vpop.eup %1286 }
 0x2ff   : > { %v921_v32 = vmul.f32 %v1287_v39, %v1831_v53  ;;  %v855_v20 = vpop.xlane.xlu0 %854 }
 0x300   : > { %1288 = vrcp.f32 %v855_v20 }
 0x301   : > { %953 = vst [vmem:[%s1746_s26 + $0xd8] sm:$0xff] %v921_v32 }
 0x306   : > { %v1289_v62 = vpop.eup %1288 }
 0x307   : > { %v922_v16 = vmul.f32 %v1289_v62, %v1835_v9  ;;  %v857_v38 = vpop.xlane.xlu1 %856 }
 0x308   : > { %1290 = vrcp.f32 %v857_v38 }
 0x309   : > { %954 = vst [vmem:[%s1746_s26 + $0xe0] sm:$0xff] %v922_v16 }
 0x30e   : > { %v1291_v21 = vpop.eup %1290 }
 0x30f   : > { %v923_v54 = vmul.f32 %v1291_v21, %v1839_v50  ;;  %v859_v31 = vpop.xlane.xlu2 %858 }
 0x310   : > { %1292 = vrcp.f32 %v859_v31 }
 0x311   : > { %955 = vst [vmem:[%s1746_s26 + $0xe8] sm:$0xff] %v923_v54 }
 0x316   : > { %v1293_v53 = vpop.eup %1292 }
 0x317   : > { %v924_v45 = vmul.f32 %v1293_v53, %v1845_v26  ;;  %v861_v3 = vpop.xlane.xlu0 %860 }
 0x318   : > { %1294 = vrcp.f32 %v861_v3 }
 0x319   : > { %956 = vst [vmem:[%s1746_s26 + $0xf0] sm:$0xff] %v924_v45 }
 0x31e   : > { %v1295_v9 = vpop.eup %1294 }
 0x31f   : > { %v925_v50 = vmul.f32 %v1295_v9, %v1851_v0 }
 0x321   : > { %957 = vst [vmem:[%s1746_s26 + $0xf8] sm:$0xff] %v925_v50 }
 0x322   : > { %1323 = shalt.err (!%p1320_p3)
}
 0x323   : > { %s1360_s23 = smov 128   ;;  %s1361_s25 = smov 8  }
 0x324   : > { %1125 = dma.vmem_to_hbm [thread:$0]  (%p1430_p5), %s972_s9, 4096, %s974_s10, %s959_s22, %s1360_s23, %s1360_s23, %s1361_s25  }
 0x325 PF: > { %p1131_p4 = scmp.ge.s32.totalorder %s1358_s21, 2  ;;  %s988_s26 = sand.u32 1, %s1346_s18  }
 0x326   : > { %s989_s30 = scalar_lea.sflag [#allocation3], %s988_s26 }
 0x327   : > { %p1128_p7 = pnand %p1131_p4, %p1434_p6 }
 0x329   : > { %p1129_p8 = pneg %p1128_p7 }
 0x32b   : > { %1341 = dma.done.wait (%p1129_p8), %s989_s30, 4096  }
 0x32c   : > { %1343 = vsyncadd (%p1129_p8), %s989_s30, 4294963200  ;;  %p15_p9 = scmp.ge.s32.totalorder %s1417_s24, 4   ;;  %s1933_s18 = smov %s1350_s19 }
 0x32d   : > { %s1934_s19 = smov %s1354_s20  ;;  %s1935_s20 = smov %s1428_s27 }
 0x32e   : > { %s1936_s21 = smov %s1417_s24  ;;  %17 = sbr.rel (!%p15_p9) target bundleno = 3 (0x3), region = 75 }
 0x333   :  { %995 = vsyncpa [#allocation3], 1 }
 0x334   :  { %997 = vsyncpa [#allocation3 + $0x1], 1 }

</bundles_post_ra>
